<compile_context>
chip_gen: v7x
topology: tpu7x:2x2x1
jax: 0.10.0
libtpu: 0.0.40
codegen_flags: <defaults>
</compile_context>

<pallas_src>
import jax
import jax.numpy as jnp
from jax.experimental import pallas as pl
from jax.experimental.pallas import tpu as pltpu


def _inception_kernel(x_ref, wa_ref, wt_ref, s_ref, o_ref):
    """x_ref: (Rb, C_in+1) = per-element zero-padded rows, last lane = validity.
    wa_ref: (C_in+1, c2_0+c3_0) fused 1x1-conv weights (+bias row).
    wt_ref: (5*D, c_tot) packed block weights of the unified 5-tap conv.
    s_ref : (B*L_out, Rb-4) 0/1 selection matrix (stride-2 + valid rows).
    o_ref : (B*L_out, c_tot)."""
    f32 = jnp.float32
    x = x_ref[...]                                   # (Rb, C_in+1)
    Rb, C1 = x.shape
    C_in = C1 - 1

    # paths 2 & 3: fused 1x1 convs; bias rides on the indicator lane so that
    # padded rows stay exactly zero (matches Conv1d zero padding).
    y23 = jnp.dot(x, wa_ref[...], preferred_element_type=f32)   # (Rb, c2_0+c3_0)

    # path 4: MaxPool1d(k=2, s=1); mask rows where either operand is a pad row.
    x_nxt = jnp.concatenate([x[1:, :], jnp.zeros((1, C1), f32)], axis=0)
    pool_ok = x[:, C_in:] * x_nxt[:, C_in:]                     # (Rb, 1)
    yp = jnp.maximum(x[:, :C_in], x_nxt[:, :C_in]) * pool_ok    # (Rb, C_in)

    # unified feature stream: [x | indicator | y2 | y3 | maxpool]
    z = jnp.concatenate([x, y23, yp], axis=-1)                  # (Rb, D)
    D = z.shape[-1]
    Rd = Rb - 4
    c_tot = o_ref.shape[-1]

    # 5-tap block conv: all four paths + all output biases in packed weights.
    wt = wt_ref[...]                                            # (5*D, c_tot)
    dense = jnp.zeros((Rd, c_tot), f32)
    for k in range(5):
        dense = dense + jnp.dot(z[k:k + Rd, :], wt[k * D:(k + 1) * D, :],
                                preferred_element_type=f32)

    # stride-2 subsample + drop boundary rows via a 0/1 selection matmul, ReLU.
    out = jnp.dot(s_ref[...], dense, preferred_element_type=f32)
    o_ref[...] = jnp.maximum(out, 0.0).astype(o_ref.dtype)


def inception_1d_pallas(x_ncl, params):
    """x_ncl: (N, C_in, L) float32 (PyTorch Conv1d layout)."""
    (w1, b1, w2a, b2a, w2b, b2b, w3a, b3a, w3b, b3b, w4, b4) = params
    N, C_in, L = x_ncl.shape
    c1, c2_0, c2_1 = w1.shape[0], w2a.shape[0], w2b.shape[0]
    c3_0, c3_1, c4 = w3a.shape[0], w3b.shape[0], w4.shape[0]
    c23 = c2_0 + c3_0
    c_tot = c1 + c2_1 + c3_1 + c4
    L_out = (L - 3) // 2 + 1
    Lp = L + 2                               # per-element padded stream length
    D = (C_in + 1) + c23 + C_in              # [x | ind | y2 | y3 | maxpool]
    f32 = jnp.float32

    # ---- batch blocking: B elements per grid step ------------------------
    if N <= 8:
        B = N                                # single grid step (full-dim blocks)
    else:
        B = 8                                # multiple of 8 -> legal sublane blocks
    N_pad = ((N + B - 1) // B) * B
    G = N_pad // B
    Rb = B * Lp
    Rd = Rb - 4

    # ---- inputs: zero-padded streams with validity indicator lane --------
    x_nlc = jnp.transpose(x_ncl, (0, 2, 1)).astype(f32)          # (N, L, C_in)
    if N_pad != N:
        x_nlc = jnp.concatenate(
            [x_nlc, jnp.zeros((N_pad - N, L, C_in), f32)], axis=0)
    x_aug = jnp.concatenate([x_nlc, jnp.ones((N_pad, L, 1), f32)], axis=-1)
    zrow = jnp.zeros((N_pad, 1, C_in + 1), f32)
    x_aug = jnp.concatenate([zrow, x_aug, zrow], axis=1)         # (N_pad, L+2, C_in+1)
    x2d = x_aug.reshape(N_pad * Lp, C_in + 1)

    # ---- fused 1x1-conv weights (bias folded via indicator lane) ---------
    wa = jnp.concatenate([w2a[:, :, 0].T, w3a[:, :, 0].T], axis=1)   # (C_in, c23)
    ba = jnp.concatenate([b2a, b3a]).reshape(1, c23)
    wa_aug = jnp.concatenate([wa, ba], axis=0).astype(f32)           # (C_in+1, c23)

    # ---- packed 5-tap block weights (all 4 paths + all output biases) ----
    # Z lanes: x [0,C_in) | ind C_in | y2 | y3 | yp ; out lanes: p1|p2|p3|p4.
    ox, oi, o2, o3, o4 = 0, C_in, C_in + 1, C_in + 1 + c2_0, C_in + 1 + c23
    p2c, p3c, p4c = c1, c1 + c2_1, c1 + c2_1 + c3_1
    b_all = jnp.concatenate([b1, b2b, b3b, b4]).astype(f32)          # (c_tot,)
    wt = jnp.zeros((5, D, c_tot), f32)
    for k in (1, 2, 3):                           # path 1: k=3, stride 2, no pad
        wt = wt.at[k, ox:ox + C_in, 0:c1].set(w1[:, :, k - 1].T)
    wt = wt.at[1, oi, :].set(b_all)               # biases via indicator tap
    for k in (0, 2, 4):                           # path 2: k=3, dilation 2, pad 1
        wt = wt.at[k, o2:o2 + c2_0, p2c:p2c + c2_1].set(w2b[:, :, k // 2].T)
    for k in range(5):                            # path 3: k=5, pad 1
        wt = wt.at[k, o3:o3 + c3_0, p3c:p3c + c3_1].set(w3b[:, :, k].T)
    for k in range(4):                            # path 4: k=4, pad 1 (on maxpool)
        wt = wt.at[k, o4:o4 + C_in, p4c:p4c + c4].set(w4[:, :, k].T)
    wt2d = wt.reshape(5 * D, c_tot)

    # ---- selection matrix: output row (b*L_out + t) <- dense row (b*Lp + 2t)
    rows = jnp.arange(B * L_out)
    tgt = (rows // L_out) * Lp + 2 * (rows % L_out)
    sel = (tgt[:, None] == jnp.arange(Rd)[None, :]).astype(f32)      # (B*L_out, Rd)

    out2d = pl.pallas_call(
        _inception_kernel,
        out_shape=jax.ShapeDtypeStruct((N_pad * L_out, c_tot), f32),
        grid_spec=pltpu.PrefetchScalarGridSpec(
            num_scalar_prefetch=0,
            grid=(G,),
            in_specs=[
                pl.BlockSpec((Rb, C_in + 1), lambda g: (g, 0)),
                pl.BlockSpec((C_in + 1, c23), lambda g: (0, 0)),
                pl.BlockSpec((5 * D, c_tot), lambda g: (0, 0)),
                pl.BlockSpec((B * L_out, Rd), lambda g: (0, 0)),
            ],
            out_specs=pl.BlockSpec((B * L_out, c_tot), lambda g: (g, 0)),
        ),
        compiler_params=pltpu.CompilerParams(
            dimension_semantics=("parallel",)),
    )(x2d, wa_aug, wt2d, sel)

    out = out2d.reshape(N_pad, L_out, c_tot)[:N]
    return jnp.transpose(out, (0, 2, 1))          # (N, c_tot, L_out)


# ------------------------- pure-JAX reference ----------------------------
def _conv1d_ref(x, w, b, stride=1, padding=0, dilation=1):
    y = jax.lax.conv_general_dilated(
        x, w, window_strides=(stride,), padding=[(padding, padding)],
        rhs_dilation=(dilation,), dimension_numbers=("NCH", "OIH", "NCH"))
    return y + b[None, :, None]


def inception_1d_ref(x, params):
    (w1, b1, w2a, b2a, w2b, b2b, w3a, b3a, w3b, b3b, w4, b4) = params
    p1 = _conv1d_ref(x, w1, b1, stride=2)
    p2 = _conv1d_ref(_conv1d_ref(x, w2a, b2a),
                     w2b, b2b, stride=2, padding=1, dilation=2)
    p3 = _conv1d_ref(_conv1d_ref(x, w3a, b3a),
                     w3b, b3b, stride=2, padding=1)
    xp = jnp.maximum(x[:, :, :-1], x[:, :, 1:])        # MaxPool1d(k=2, s=1)
    p4 = _conv1d_ref(xp, w4, b4, stride=2, padding=1)
    return jax.nn.relu(jnp.concatenate([p1, p2, p3, p4], axis=1))


if __name__ == "__main__":
    key = jax.random.PRNGKey(0)
    N, C_in, L = 2, 4, 16
    cp1, cp2, cp3, cp4 = [8], [4, 16], [4, 8], [8]

    ks = jax.random.split(key, 13)

    def mk(k, shape, scale=0.2):
        return scale * jax.random.normal(k, shape, jnp.float32)

    params = (
        mk(ks[0], (cp1[0], C_in, 3)),   mk(ks[1], (cp1[0],)),
        mk(ks[2], (cp2[0], C_in, 1)),   mk(ks[3], (cp2[0],)),
        mk(ks[4], (cp2[1], cp2[0], 3)), mk(ks[5], (cp2[1],)),
        mk(ks[6], (cp3[0], C_in, 1)),   mk(ks[7], (cp3[0],)),
        mk(ks[8], (cp3[1], cp3[0], 5)), mk(ks[9], (cp3[1],)),
        mk(ks[10], (cp4[0], C_in, 4)),  mk(ks[11], (cp4[0],)),
    )
    x = jax.random.normal(ks[12], (N, C_in, L), jnp.float32)

    fwd = jax.jit(inception_1d_pallas)
    out = jax.block_until_ready(fwd(x, params))
    ref = jax.block_until_ready(inception_1d_ref(x, params))

    L_out = (L - 3) // 2 + 1
    c_tot = cp1[0] + cp2[1] + cp3[1] + cp4[0]
    assert out.shape == (N, c_tot, L_out), out.shape
    assert jnp.allclose(out, ref, atol=1e-4, rtol=1e-4), \
        float(jnp.max(jnp.abs(out - ref)))
    print("KERNEL_OK")
</pallas_src>

<mosaic_0001>
module attributes {stable_mosaic.version = 11 : i64} {
  func.func @_inception_kernel(%arg0: i32, %arg1: memref<36x5xf32, #tpu.memory_space<vmem>>, %arg2: memref<5x8xf32, #tpu.memory_space<vmem>>, %arg3: memref<85x40xf32, #tpu.memory_space<vmem>>, %arg4: memref<14x32xf32, #tpu.memory_space<vmem>>, %arg5: memref<14x40xf32, #tpu.memory_space<vmem>>) attributes {dimension_semantics = [#tpu.dimension_semantics<parallel>], iteration_bounds = array<i64: 1>, scalar_prefetch = 0 : i64, scratch_operands = 0 : i64, tpu.core_type = #tpu.core_type<tc>, window_params = [{transform_indices = @transform_0, window_bounds = array<i64: 36, 5>}, {pipeline_mode = #tpu.pipeline_mode<synchronous>, transform_indices = @transform_1, window_bounds = array<i64: 5, 8>}, {pipeline_mode = #tpu.pipeline_mode<synchronous>, transform_indices = @transform_2, window_bounds = array<i64: 85, 40>}, {pipeline_mode = #tpu.pipeline_mode<synchronous>, transform_indices = @transform_3, window_bounds = array<i64: 14, 32>}, {transform_indices = @transform_4, window_bounds = array<i64: 14, 40>}]} {
    %c0 = arith.constant 0 : index
    %c0_0 = arith.constant 0 : index
    %0 = vector.load %arg1[%c0, %c0_0] : memref<36x5xf32, #tpu.memory_space<vmem>>, vector<36x5xf32>
    %c0_1 = arith.constant 0 : index
    %c0_2 = arith.constant 0 : index
    %1 = vector.load %arg2[%c0_1, %c0_2] : memref<5x8xf32, #tpu.memory_space<vmem>>, vector<5x8xf32>
    %cst = arith.constant dense<0.000000e+00> : vector<36x8xf32>
    %2 = tpu.matmul %0, %1, %cst {dimension_numbers = #tpu.dot_dimension_numbers<[1], [0], [0], [1], [0, 0, 1, 1], [], []>} : vector<36x5xf32>, vector<5x8xf32>, vector<36x8xf32> -> vector<36x8xf32>
    %3 = vector.extract_strided_slice %0 {offsets = [1, 0], sizes = [35, 5], strides = [1, 1]} : vector<36x5xf32> to vector<35x5xf32>
    %cst_3 = arith.constant 0.000000e+00 : f32
    %4 = vector.broadcast %cst_3 : f32 to vector<1x5xf32>
    %5 = tpu.concatenate %3, %4 in 0 : vector<35x5xf32>, vector<1x5xf32> -> vector<36x5xf32>
    %6 = vector.extract_strided_slice %0 {offsets = [0, 4], sizes = [36, 1], strides = [1, 1]} : vector<36x5xf32> to vector<36x1xf32>
    %7 = vector.extract_strided_slice %5 {offsets = [0, 4], sizes = [36, 1], strides = [1, 1]} : vector<36x5xf32> to vector<36x1xf32>
    %8 = arith.mulf %6, %7 : vector<36x1xf32>
    %9 = vector.extract_strided_slice %0 {offsets = [0, 0], sizes = [36, 4], strides = [1, 1]} : vector<36x5xf32> to vector<36x4xf32>
    %10 = vector.extract_strided_slice %5 {offsets = [0, 0], sizes = [36, 4], strides = [1, 1]} : vector<36x5xf32> to vector<36x4xf32>
    %11 = arith.maximumf %9, %10 : vector<36x4xf32>
    %12 = vector.broadcast %8 : vector<36x1xf32> to vector<36x4xf32>
    %13 = arith.mulf %11, %12 : vector<36x4xf32>
    %14 = tpu.concatenate %0, %2, %13 in 1 : vector<36x5xf32>, vector<36x8xf32>, vector<36x4xf32> -> vector<36x17xf32>
    %c0_4 = arith.constant 0 : index
    %c0_5 = arith.constant 0 : index
    %15 = vector.load %arg3[%c0_4, %c0_5] : memref<85x40xf32, #tpu.memory_space<vmem>>, vector<85x40xf32>
    %cst_6 = arith.constant 0.000000e+00 : f32
    %16 = vector.broadcast %cst_6 : f32 to vector<32x40xf32>
    %17 = vector.extract_strided_slice %14 {offsets = [0, 0], sizes = [32, 17], strides = [1, 1]} : vector<36x17xf32> to vector<32x17xf32>
    %18 = vector.extract_strided_slice %15 {offsets = [0, 0], sizes = [17, 40], strides = [1, 1]} : vector<85x40xf32> to vector<17x40xf32>
    %cst_7 = arith.constant dense<0.000000e+00> : vector<32x40xf32>
    %19 = tpu.matmul %17, %18, %cst_7 {dimension_numbers = #tpu.dot_dimension_numbers<[1], [0], [0], [1], [0, 0, 1, 1], [], []>} : vector<32x17xf32>, vector<17x40xf32>, vector<32x40xf32> -> vector<32x40xf32>
    %20 = arith.addf %16, %19 : vector<32x40xf32>
    %21 = vector.extract_strided_slice %14 {offsets = [1, 0], sizes = [32, 17], strides = [1, 1]} : vector<36x17xf32> to vector<32x17xf32>
    %22 = vector.extract_strided_slice %15 {offsets = [17, 0], sizes = [17, 40], strides = [1, 1]} : vector<85x40xf32> to vector<17x40xf32>
    %cst_8 = arith.constant dense<0.000000e+00> : vector<32x40xf32>
    %23 = tpu.matmul %21, %22, %cst_8 {dimension_numbers = #tpu.dot_dimension_numbers<[1], [0], [0], [1], [0, 0, 1, 1], [], []>} : vector<32x17xf32>, vector<17x40xf32>, vector<32x40xf32> -> vector<32x40xf32>
    %24 = arith.addf %20, %23 : vector<32x40xf32>
    %25 = vector.extract_strided_slice %14 {offsets = [2, 0], sizes = [32, 17], strides = [1, 1]} : vector<36x17xf32> to vector<32x17xf32>
    %26 = vector.extract_strided_slice %15 {offsets = [34, 0], sizes = [17, 40], strides = [1, 1]} : vector<85x40xf32> to vector<17x40xf32>
    %cst_9 = arith.constant dense<0.000000e+00> : vector<32x40xf32>
    %27 = tpu.matmul %25, %26, %cst_9 {dimension_numbers = #tpu.dot_dimension_numbers<[1], [0], [0], [1], [0, 0, 1, 1], [], []>} : vector<32x17xf32>, vector<17x40xf32>, vector<32x40xf32> -> vector<32x40xf32>
    %28 = arith.addf %24, %27 : vector<32x40xf32>
    %29 = vector.extract_strided_slice %14 {offsets = [3, 0], sizes = [32, 17], strides = [1, 1]} : vector<36x17xf32> to vector<32x17xf32>
    %30 = vector.extract_strided_slice %15 {offsets = [51, 0], sizes = [17, 40], strides = [1, 1]} : vector<85x40xf32> to vector<17x40xf32>
    %cst_10 = arith.constant dense<0.000000e+00> : vector<32x40xf32>
    %31 = tpu.matmul %29, %30, %cst_10 {dimension_numbers = #tpu.dot_dimension_numbers<[1], [0], [0], [1], [0, 0, 1, 1], [], []>} : vector<32x17xf32>, vector<17x40xf32>, vector<32x40xf32> -> vector<32x40xf32>
    %32 = arith.addf %28, %31 : vector<32x40xf32>
    %33 = vector.extract_strided_slice %14 {offsets = [4, 0], sizes = [32, 17], strides = [1, 1]} : vector<36x17xf32> to vector<32x17xf32>
    %34 = vector.extract_strided_slice %15 {offsets = [68, 0], sizes = [17, 40], strides = [1, 1]} : vector<85x40xf32> to vector<17x40xf32>
    %cst_11 = arith.constant dense<0.000000e+00> : vector<32x40xf32>
    %35 = tpu.matmul %33, %34, %cst_11 {dimension_numbers = #tpu.dot_dimension_numbers<[1], [0], [0], [1], [0, 0, 1, 1], [], []>} : vector<32x17xf32>, vector<17x40xf32>, vector<32x40xf32> -> vector<32x40xf32>
    %36 = arith.addf %32, %35 : vector<32x40xf32>
    %c0_12 = arith.constant 0 : index
    %c0_13 = arith.constant 0 : index
    %37 = vector.load %arg4[%c0_12, %c0_13] : memref<14x32xf32, #tpu.memory_space<vmem>>, vector<14x32xf32>
    %cst_14 = arith.constant dense<0.000000e+00> : vector<14x40xf32>
    %38 = tpu.matmul %37, %36, %cst_14 {dimension_numbers = #tpu.dot_dimension_numbers<[1], [0], [0], [1], [0, 0, 1, 1], [], []>} : vector<14x32xf32>, vector<32x40xf32>, vector<14x40xf32> -> vector<14x40xf32>
    %cst_15 = arith.constant 0.000000e+00 : f32
    %39 = vector.broadcast %cst_15 : f32 to vector<14x40xf32>
    %40 = arith.maximumf %38, %39 : vector<14x40xf32>
    %c0_16 = arith.constant 0 : index
    %c0_17 = arith.constant 0 : index
    %41 = vector.load %arg5[%c0_16, %c0_17] : memref<14x40xf32, #tpu.memory_space<vmem>>, vector<14x40xf32>
    tpu.vector_store %arg5[%c0_16, %c0_17], %40 {strides = array<i32>} : memref<14x40xf32, #tpu.memory_space<vmem>>, vector<14x40xf32>,
    return
  }
  func.func @transform_0(%arg0: i32) -> (i32, i32) {
    %c0_i32 = arith.constant 0 : i32
    %c0_i32_0 = arith.constant 0 : i32
    return %arg0, %c0_i32 : i32, i32
  }
  func.func @transform_1(%arg0: i32) -> (i32, i32) {
    %c0_i32 = arith.constant 0 : i32
    %c0_i32_0 = arith.constant 0 : i32
    %c0_i32_1 = arith.constant 0 : i32
    return %c0_i32, %c0_i32_0 : i32, i32
  }
  func.func @transform_2(%arg0: i32) -> (i32, i32) {
    %c0_i32 = arith.constant 0 : i32
    %c0_i32_0 = arith.constant 0 : i32
    %c0_i32_1 = arith.constant 0 : i32
    return %c0_i32, %c0_i32_0 : i32, i32
  }
  func.func @transform_3(%arg0: i32) -> (i32, i32) {
    %c0_i32 = arith.constant 0 : i32
    %c0_i32_0 = arith.constant 0 : i32
    %c0_i32_1 = arith.constant 0 : i32
    return %c0_i32, %c0_i32_0 : i32, i32
  }
  func.func @transform_4(%arg0: i32) -> (i32, i32) {
    %c0_i32 = arith.constant 0 : i32
    %c0_i32_0 = arith.constant 0 : i32
    return %arg0, %c0_i32 : i32, i32
  }
}

</mosaic_0001>

<bundles_post_ra>
// kernel: inception_1d_pallas.1
= control target key start
LH: loop header
LB: loop body
LE: loop exit
PB: predicated region body
PF: predicated region fallthrough
CT: control target
= control target key end

     0   :  { %vm39_vm0 = vcmask 1044480   ;;  %vm23_vm1 = vcmask 39936   ;;  %v1134_v0 = vmov 0.0   ;;  %vm1135_vm2 = vmmov 0   ;;  %s1138_s14 = smov 5   ;;  %s1404_s1 = inlined_call_operand.vmem [shape: f32[5,8], index: 1, kind: input, shape index: {}]   ;;  %s1405_s0 = inlined_call_operand.vmem [shape: f32[36,5], index: 0, kind: input, shape index: {}]   ;;  %s1406_s2 = inlined_call_operand.vmem [shape: f32[85,40], index: 2, kind: input, shape index: {}]   ;;  %s1407_s3 = inlined_call_operand.vmem [shape: f32[14,32], index: 3, kind: input, shape index: {}]   ;;  %s1408_s4 = inlined_call_operand.vmem [shape: f32[14,40], index: 4, kind: output, shape index: {}]  }
   0x1   :  { %995 = vmatprep.subr.mxu0 %v1134_v0  ;;  %v22_v1 = vld [vmem:[%s1404_s1] sm:$0x1f]  ;;  %997 = vmatprep.mubr.msk.f32.mxu0 %vm1135_vm2, %v1134_v0  ;;  %v1176_v3 = vld [vmem:[%s1405_s0 + $0x8] sm:$0xff]  ;;  %vm133_vm3 = vcmask 1046528   ;;  %v1182_v4 = vld [vmem:[%s1405_s0 + $0x10] sm:$0xff]  ;;  %v1136_v6 = vmov 4  }
   0x2   :  { %v1171_v2 = vld [vmem:[%s1405_s0] sm:$0xff]  ;;  %996 = vmatpush3.msk.msra.mxu0 %vm39_vm0, %v22_v1  ;;  %v1187_v5 = vld [vmem:[%s1405_s0 + $0x18] sm:$0xff]  ;;  %1132 = vset.pattern.permute.xlu0 %v1136_v6  ;;  %v135_v8 = vrot.slane %v1176_v3, 1  ;;  %v137_v10 = vrot.slane %v1182_v4, 1  ;;  %vm148_vm4 = vcmask 1042432   ;;  %v242_v30 = vld [vmem:[%s1406_s2 + $0x8] sm:$0xff] }
   0x3   :  { %v134_v7 = vrot.slane %v1171_v2, 1  ;;  %998 = vmatmul.mubr.msk.f32.vlgmr.msra.gmra.mrb[0].mxu0 %vm23_vm1, %v1171_v2  ;;  %v1196_v9 = vld [vmem:[%s1405_s0 + $0x20] sm:$0xf]  ;;  %1133 = vset.pattern.permute.xlu1 %v1136_v6  ;;  %v139_v11 = vrot.slane %v1187_v5, 1  ;;  %s1137_s0 = smov 13   ;;  %v243_v32 = vld [vmem:[%s1406_s2 + $0x10] sm:$0xff] }
   0x4   :  { %1000 = vmatprep.mubr.msk.f32.mxu0 %vm1135_vm2, %v1134_v0  ;;  %v141_v13 = vrot.slane %v1196_v9, 1  ;;  %v138_v15 = vsel %vm133_vm3, %v135_v8, %v137_v10  ;;  %v241_v29 = vld [vmem:[%s1406_s2] sm:$0xff]  ;;  %vm285_vm5 = vcmask 1040384   ;;  %v244_v33 = vld [vmem:[%s1406_s2 + $0x18] sm:$0xff]  ;;  %v269_v35 = vrot.slane %v243_v32, 1  ;;  %v246_v41 = vld [vmem:[%s1406_s2 + $0x28] sm:$0xff] }
   0x5   :  { %v136_v12 = vsel %vm133_vm3, %v134_v7, %v135_v8  ;;  %v1206_v16 = vsel %vm133_vm3, %v137_v10, %v139_v11  ;;  %v151_v19 = vmul.f32 %v138_v15, %v1176_v3  ;;  %v156_v26 = vmax.f32 %v1176_v3, %v138_v15  ;;  %v245_v34 = vld [vmem:[%s1406_s2 + $0x20] sm:$0xff]  ;;  %v247_v42 = vld [vmem:[%s1406_s2 + $0x30] sm:$0xff]  ;;  %v248_v54 = vld [vmem:[%s1406_s2 + $0x38] sm:$0xff] }
   0x6   :  { %v150_v14 = vmul.f32 %v136_v12, %v1171_v2  ;;  %v152_v17 = vmul.f32 %v1206_v16, %v1182_v4  ;;  %v1211_v18 = vsel %vm133_vm3, %v139_v11, %v141_v13  ;;  %v1217_v20 = vsel %vm148_vm4, %v141_v13, 0.0  ;;  %v1277_v55 = vld [vmem:[%s1406_s2 + $0x40] sm:$0xff] }
   0x7   :  { %1001 = vmatmul.mubr.msk.f32.gmra.mrb[2].mxu0 %vm23_vm1, %v1176_v3  ;;  %v153_v21 = vmul.f32 %v1211_v18, %v1187_v5  ;;  %v154_v22 = vmul.f32 %v1217_v20, %v1196_v9  ;;  %v155_v23 = vmax.f32 %v1171_v2, %v136_v12  ;;  %v1087_v31 = vpack.c.bf16 %v242_v30, %v241_v29 }
   0x8   :  { %162 = vperm.xlu0 %1132, %v150_v14   ;;  %1003 = vmatprep.mubr.msk.f32.mxu0 %vm1135_vm2, %v1134_v0  ;;  %v270_v36 = vrot.slane %v244_v33, 1  ;;  %v272_v37 = vrot.slane %v245_v34, 1  ;;  %v480_v43 = vrot.slane %v245_v34, 2  ;;  %v481_v44 = vrot.slane %v246_v41, 2  ;;  %v251_v33 = vld [vmem:[%s1406_s2 + $0x50] sm:$0x1f] }
   0x9   :  { %172 = vperm.xlu1 %1133, %v152_v17   ;;  %1088 = vmatprep.subr.bf16.mxu1 %v1087_v31  ;;  %v1260_v45 = vrot.slane %v247_v42, 2  ;;  %vm468_vm6 = vcmask 1045504   ;;  %v157_v53 = vmax.f32 %v1182_v4, %v1206_v16  ;;  %v597_v57 = vrot.slane %v247_v42, 3 }
   0xa   :  { %1090 = vmatpush3.bf16.msra.mxu1 %v1087_v31  ;;  %v271_v38 = vsel %vm133_vm3, %v269_v35, %v270_v36  ;;  %v273_v39 = vsel %vm133_vm3, %v270_v36, %v272_v37  ;;  %v482_v47 = vsel %vm468_vm6, %v480_v43, %v481_v44  ;;  %v598_v58 = vrot.slane %v248_v54, 3 }
   0xb   :  { %1004 = vmatmul.mubr.msk.f32.gmra.mrb[4].mxu0 %vm23_vm1, %v1182_v4  ;;  %1028 = vmatprep.subr.msk.mxu1 %vm285_vm5, %v243_v32  ;;  %v1083_v40 = vpack.c.bf16 %v273_v39, %v271_v38  ;;  %v484_v48 = vsel %vm468_vm6, %v481_v44, %v1260_v45  ;;  %v1280_v59 = vrot.slane %v1277_v55, 3  ;;  %v158_v6 = vmax.f32 %v1187_v5, %v1211_v18 }
   0xc   :  { %167 = vperm.xlu0 %1132, %v151_v19   ;;  %1006 = vmatprep.mubr.msk.f32.mxu0 %vm1135_vm2, %v1134_v0  ;;  %v1091_v50 = vpack.c.bf16 %v484_v48, %v482_v47  ;;  %v599_v61 = vsel %vm39_vm0, %v597_v57, %v598_v58  ;;  %v159_v11 = vmax.f32 %v1196_v9, %v1217_v20  ;;  %vm235_vm7 = vcmask 105472  }
   0xd   :  { %177 = vperm.xlu1 %1133, %v153_v21   ;;  %1084 = vmatprep.subr.bf16.mxu0 %v1083_v40  ;;  %v601_v62 = vsel %vm39_vm0, %v598_v58, %v1280_v59  ;;  %vm276_vm8 = vcmask 138240   ;;  %v715_v39 = vrot.slane %v1277_v55, 4  ;;  %v718_v43 = vrot.slane %v251_v33, 4 }
   0xe   :  { %1029 = vmatpush3.msk.msra.mxu1 %vm285_vm5, %v243_v32  ;;  %1086 = vmatpush3.bf16.msra.mxu0 %v1083_v40  ;;  %v1286_v1 = vpack.c.bf16 %v601_v62, %v599_v61  ;;  %vm703_vm9 = vcmask 1043456   ;;  %vm823_vm10 = vcmask 261120   ;;  %vm909_vm11 = vcmask 324608  }
   0xf   :  { %1007 = vmatmul.mubr.msk.f32.gmra.mrb[6].mxu0 %vm23_vm1, %v1187_v5  ;;  %1016 = vmatprep.subr.msk.mxu0 %vm285_vm5, %v272_v37  ;;  %vm907_vm12 = vcmask 326656  }
  0x10   :  { %182 = vperm.xlu0 %1132, %v154_v22   ;;  %1009 = vmatprep.mubr.msk.f32.mxu0 %vm1135_vm2, %v1134_v0 }
  0x11   :  { %1092 = vmatprep.subr.bf16.mxu1 %v1091_v50 }
  0x12   :  { %1017 = vmatpush3.msk.msra.mxu0 %vm285_vm5, %v272_v37 }
  0x13   :  { %1010 = vmatmul.mubr.msk.f32.gmra.mrb[8].mxu0 %vm23_vm1, %v1196_v9 }
  0x87   :  { %v163_v24 = vpop.permute.xlu0 %162 }
  0x88   :  { %v185_v25 = vmul.f32 %v163_v24, %v155_v23  ;;  %v173_v56 = vpop.permute.xlu1 %172 }
  0x89   :  { %v187_v63 = vmul.f32 %v173_v56, %v157_v53 }
  0x8a   :  { %215 = vrot.lane.b32.xlu1 %v185_v25, %s1137_s0 }
  0x8b   :  { %v168_v27 = vpop.permute.xlu0 %167 }
  0x8c   :  { %v186_v28 = vmul.f32 %v168_v27, %v156_v26  ;;  %v178_v7 = vpop.permute.xlu1 %177 }
  0x8d   :  { %v188_v12 = vmul.f32 %v178_v7, %v158_v6 }
  0x8e   :  { %217 = vrot.lane.b32.xlu0 %v186_v28, %s1137_s0 }
  0x8f   :  { %v183_v13 = vpop.permute.xlu0 %182 }
  0x90   :  { %v189_v16 = vmul.f32 %v183_v13, %v159_v11 }
  0xd6   :  { %v109_v46 = vpop.f32.mrb[0].mxu0 }
  0xd7   :  { %195 = vrot.lane.b32.xlu1 %v109_v46, %s1138_s14  ;;  %v999_v49 = vpop.f32.mrb[1].mxu0 }
  0xda   :  { %v114_v51 = vpop.f32.mrb[2].mxu0 }
  0xdb   :  { %197 = vrot.lane.b32.xlu0 %v114_v51, %s1138_s14  ;;  %v1002_v52 = vpop.f32.mrb[3].mxu0 }
  0xde   :  { %v119_v60 = vpop.f32.mrb[4].mxu0 }
  0xdf   :  { %199 = vrot.lane.b32.xlu1 %v119_v60, %s1138_s14  ;;  %v1005_v0 = vpop.f32.mrb[5].mxu0 }
  0xe2   :  { %v124_v8 = vpop.f32.mrb[6].mxu0 }
  0xe3   :  { %219 = vrot.lane.b32.xlu1 %v187_v63, %s1137_s0  ;;  %201 = vrot.lane.b32.xlu0 %v124_v8, %s1138_s14  ;;  %v1008_v10 = vpop.f32.mrb[7].mxu0 }
  0xe6   :  { %v129_v14 = vpop.f32.mrb[8].mxu0 }
  0xe7   :  { %221 = vrot.lane.b32.xlu0 %v188_v12, %s1137_s0  ;;  %203 = vrot.lane.b32.xlu1 %v129_v14, %s1138_s14  ;;  %v1011_v15 = vpop.f32.mrb[9].mxu0 }
  0xeb   :  { %223 = vrot.lane.b32.xlu0 %v189_v16, %s1137_s0 }
  0xfc   :  { %v216_v17 = vpop.permute.xlu1 %215 }
 0x100   :  { %v218_v18 = vpop.permute.xlu0 %217 }
 0x149   :  { %v196_v19 = vpop.permute.xlu1 %195 }
 0x14a   :  { %v230_v21 = vsel %vm23_vm1, %v1171_v2, %v196_v19 }
 0x14b   :  { %v1300_v20 = vsel %vm235_vm7, %v230_v21, %v216_v17  ;;  %v821_v17 = vld [vmem:[%s1407_s3] sm:$0xff] }
 0x14c   :  { %1030 = vmatprep.mubr.msk.f32.mxu1 %vm276_vm8, %v1300_v20  ;;  %v257_v25 = vrot.slane %v1300_v20, 1  ;;  %v469_v37 = vrot.slane %v1300_v20, 2  ;;  %v586_v58 = vrot.slane %v1300_v20, 3  ;;  %v704_v8 = vrot.slane %v1300_v20, 4 }
 0x14d   :  { %v198_v22 = vpop.permute.xlu0 %197 }
 0x14e   :  { %v231_v23 = vsel %vm23_vm1, %v1176_v3, %v198_v22 }
 0x14f   :  { %v1307_v24 = vsel %vm235_vm7, %v231_v23, %v218_v18 }
 0x150   :  { %1031 = vmatmul.mubr.msk.f32.vlgmr.msra.gmra.mrb[0].mxu1 %vm276_vm8, %v1307_v24  ;;  %v258_v2 = vrot.slane %v1307_v24, 1  ;;  %v470_v32 = vrot.slane %v1307_v24, 2  ;;  %v587_v55 = vrot.slane %v1307_v24, 3  ;;  %v705_v7 = vrot.slane %v1307_v24, 4 }
 0x151   :  { %v200_v26 = vpop.permute.xlu1 %199  ;;  %1094 = vmatpush3.bf16.msra.mxu1 %v1091_v50 }
 0x152   :  { %v259_v27 = vsel %vm133_vm3, %v257_v25, %v258_v2  ;;  %1040 = vmatprep.subr.msk.mxu1 %vm285_vm5, %v1260_v45  ;;  %v232_v3 = vsel %vm23_vm1, %v1182_v4, %v200_v26  ;;  %v250_v4 = vld [vmem:[%s1406_s2 + $0x48] sm:$0xff]  ;;  %v588_v62 = vsel %vm39_vm0, %v586_v58, %v587_v55  ;;  %v706_v11 = vsel %vm703_vm9, %v704_v8, %v705_v7 }
 0x153   :  { %1018 = vmatprep.mubr.msk.f32.mxu0 %vm276_vm8, %v259_v27  ;;  %v716_v42 = vrot.slane %v250_v4, 4 }
 0x155   :  { %v220_v28 = vpop.permute.xlu1 %219  ;;  %v202_v29 = vpop.permute.xlu0 %201  ;;  %1041 = vmatpush3.msk.msra.mxu1 %vm285_vm5, %v1260_v45  ;;  %v717_v51 = vsel %vm703_vm9, %v715_v39, %v716_v42  ;;  %v719_v52 = vsel %vm703_vm9, %v716_v42, %v718_v43 }
 0x156   :  { %v1322_v30 = vsel %vm235_vm7, %v232_v3, %v220_v28  ;;  %1096 = vmatprep.subr.bf16.mxu1 %v1286_v1  ;;  %v233_v34 = vsel %vm23_vm1, %v1187_v5, %v202_v29  ;;  %v471_v5 = vsel %vm468_vm6, %v469_v37, %v470_v32  ;;  %v1099_v60 = vpack.c.bf16 %v719_v52, %v717_v51 }
 0x157   :  { %v260_v31 = vrot.slane %v1322_v30, 1  ;;  %1033 = vmatprep.mubr.msk.f32.mxu1 %vm276_vm8, %v1322_v30  ;;  %v472_v40 = vrot.slane %v1322_v30, 2  ;;  %v589_v61 = vrot.slane %v1322_v30, 3 }
 0x159   :  { %v222_v35 = vpop.permute.xlu0 %221  ;;  %v261_v36 = vsel %vm133_vm3, %v258_v2, %v260_v31  ;;  %v204_v38 = vpop.permute.xlu1 %203  ;;  %v473_v50 = vsel %vm468_vm6, %v470_v32, %v472_v40 }
 0x15a   :  { %v239_v41 = vsel %vm235_vm7, %v233_v34, %v222_v35  ;;  %1019 = vmatmul.mubr.msk.f32.vlgmr.msra.gmra.mrb[10].mxu0 %vm276_vm8, %v261_v36  ;;  %v234_v44 = vsel %vm23_vm1, %v1196_v9, %v204_v38 }
 0x15b   :  { %1034 = vmatmul.mubr.msk.f32.gmra.mrb[2].mxu1 %vm276_vm8, %v239_v41  ;;  %v262_v45 = vrot.slane %v239_v41, 1  ;;  %v474_v46 = vrot.slane %v239_v41, 2  ;;  %v591_v63 = vrot.slane %v239_v41, 3  ;;  %v709_v12 = vrot.slane %v239_v41, 4 }
 0x15c   :  { %1042 = vmatprep.mubr.msk.f32.mxu1 %vm276_vm8, %v471_v5 }
 0x15d   :  { %v224_v47 = vpop.permute.xlu0 %223  ;;  %v263_v48 = vsel %vm133_vm3, %v260_v31, %v262_v45  ;;  %v475_v54 = vsel %vm468_vm6, %v472_v40, %v474_v46  ;;  %v592_v6 = vsel %vm39_vm0, %v589_v61, %v591_v63 }
 0x15e   :  { %v240_v49 = vsel %vm235_vm7, %v234_v44, %v224_v47  ;;  %1021 = vmatprep.mubr.msk.f32.mxu0 %vm276_vm8, %v263_v48 }
 0x15f   :  { %v264_v53 = vrot.slane %v240_v49, 1  ;;  %v476_v9 = vrot.slane %v240_v49, 2  ;;  %1043 = vmatmul.mubr.msk.f32.vlgmr.msra.gmra.mrb[0].mxu1 %vm276_vm8, %v473_v50  ;;  %v593_v0 = vrot.slane %v240_v49, 3  ;;  %v711_v13 = vrot.slane %v240_v49, 4 }
 0x160   :  { %1045 = vmatprep.mubr.msk.f32.mxu1 %vm276_vm8, %v475_v54  ;;  %1098 = vmatpush3.bf16.msra.mxu1 %v1286_v1  ;;  %v590_v1 = vsel %vm39_vm0, %v587_v55, %v589_v61 }
 0x161   :  { %v265_v56 = vsel %vm133_vm3, %v262_v45, %v264_v53  ;;  %v477_v57 = vsel %vm468_vm6, %v474_v46, %v476_v9  ;;  %1052 = vmatprep.subr.msk.mxu1 %vm285_vm5, %v1280_v59  ;;  %v594_v10 = vsel %vm39_vm0, %v591_v63, %v593_v0  ;;  %v712_v16 = vsel %vm703_vm9, %v709_v12, %v711_v13 }
 0x162   :  { %1022 = vmatmul.mubr.msk.f32.gmra.mrb[12].mxu0 %vm276_vm8, %v265_v56 }
 0x163   :  { %1046 = vmatmul.mubr.msk.f32.gmra.mrb[2].mxu1 %vm276_vm8, %v477_v57  ;;  %1080 = vmatprep.mubr.msk.f32.mxu0 %vm823_vm10, %v821_v17 }
 0x164   :  { %1053 = vmatpush3.msk.msra.mxu1 %vm285_vm5, %v1280_v59  ;;  %1054 = vmatprep.mubr.msk.f32.mxu1 %vm276_vm8, %v588_v62  ;;  %v707_v59 = vrot.slane %v1322_v30, 4  ;;  %v822_v30 = vld [vmem:[%s1407_s3 + $0x8] sm:$0x3f] }
 0x165   :  { %1100 = vmatprep.subr.bf16.mxu1 %v1099_v60 }
 0x166   :  { %v708_v14 = vsel %vm703_vm9, %v705_v7, %v707_v59  ;;  %v710_v15 = vsel %vm703_vm9, %v707_v59, %v709_v12 }
 0x167   :  { %1055 = vmatmul.mubr.msk.f32.vlgmr.msra.gmra.mrb[0].mxu1 %vm276_vm8, %v590_v1 }
 0x168   :  { %1057 = vmatprep.mubr.msk.f32.mxu1 %vm276_vm8, %v592_v6  ;;  %1102 = vmatpush3.bf16.msra.mxu1 %v1099_v60 }
 0x169   :  { %1064 = vmatprep.subr.msk.mxu1 %vm285_vm5, %v718_v43 }
 0x16b   :  { %1058 = vmatmul.mubr.msk.f32.gmra.mrb[2].mxu1 %vm276_vm8, %v594_v10 }
 0x16c   :  { %1065 = vmatpush3.msk.msra.mxu1 %vm285_vm5, %v718_v43  ;;  %1066 = vmatprep.mubr.msk.f32.mxu1 %vm276_vm8, %v706_v11 }
 0x16f   :  { %1067 = vmatmul.mubr.msk.f32.vlgmr.msra.gmra.mrb[0].mxu1 %vm276_vm8, %v708_v14 }
 0x170   :  { %1069 = vmatprep.mubr.msk.f32.mxu1 %vm276_vm8, %v710_v15 }
 0x173   :  { %1070 = vmatmul.mubr.msk.f32.gmra.mrb[2].mxu1 %vm276_vm8, %v712_v16 }
 0x22d   :  { %v1020_v18 = vpop.f32.mrb[10].mxu0 }
 0x22e   :  { %v354_v19 = vpop.f32.mrb[11].mxu0 }
 0x235   :  { %v1023_v21 = vpop.f32.mrb[12].mxu0 }
 0x236   :  { %v364_v20 = vpop.f32.mrb[13].mxu0 }
 0x242   :  { %v1068_v22 = vpop.f32.mrb[0].mxu1 }
 0x243   :  { %v1111_v23 = vadd.f32 %v1068_v22, %v1020_v18  ;;  %v798_v24 = vpop.f32.mrb[1].mxu1 }
 0x244   :  { %v1112_v25 = vadd.f32 %v798_v24, %v354_v19 }
 0x246   :  { %v1103_v2 = vpack.c.bf16 %v1111_v23, %v1112_v25  ;;  %v1071_v26 = vpop.f32.mrb[2].mxu1 }
 0x247   :  { %v1113_v27 = vadd.f32 %v1071_v26, %v1023_v21  ;;  %v808_v3 = vpop.f32.mrb[3].mxu1 }
 0x248   :  { %v1114_v28 = vadd.f32 %v808_v3, %v364_v20  ;;  %1104 = vmatprep.subr.bf16.mxu0 %v1103_v2 }
 0x249   :  { %1106 = vmatpush3.bf16.msra.mxu0 %v1103_v2 }
 0x24a   :  { %v1107_v29 = vpack.c.bf16 %v1113_v27, %v1114_v28 }
 0x24c   :  { %1108 = vmatprep.subr.bf16.mxu0 %v1107_v29 }
 0x24d   :  { %1110 = vmatpush3.bf16.msra.mxu0 %v1107_v29 }
 0x250   :  { %1081 = vmatmul.mubr.msk.f32.vlgmr.msra.gmra.mrb[14].mxu0 %vm823_vm10, %v822_v30 }
 0x323   :  { %v1082_v31 = vpop.f32.mrb[14].mxu0 }
 0x324   :  { %v906_v32 = vmax.f32 %v1082_v31, 0.0  ;;  %v896_v4 = vpop.f32.mrb[15].mxu0 }
 0x325   :  { %v905_v33 = vmax.f32 %v896_v4, 0.0 }
 0x326   :  { %910 = vst.msk [vmem:[%s1408_s4 + $0x8] sm:$0x3f] %vm909_vm11, %v906_v32 }
 0x327   :  { %908 = vst.msk [vmem:[%s1408_s4] sm:$0xff] %vm907_vm12, %v905_v33 }

</bundles_post_ra>
